<compile_context>
chip_gen: v7x
topology: tpu7x:2x2x1
jax: 0.10.0
libtpu: 0.0.40
codegen_flags: <defaults>
</compile_context>

<pallas_src>
import jax
import jax.numpy as jnp
from jax.experimental import pallas as pl
from jax.experimental.pallas import tpu as pltpu

# ----------------------------- configuration --------------------------------
QUERY_MAXLEN = 8      # small stand-in for query_maxlen=128
DOC_MAXLEN = 16       # small stand-in for doc_maxlen=128
HIDDEN = 32           # small stand-in for bert hidden_size=768
DIM = 128             # ColBERT projection dim (kept at 128, lane-aligned)
VOCAB = 64
PAD_ID = 0

# Batch-tile / VMEM guidance (review): v7x cap TB ~32-48 and stay under its
# 64 MiB VMEM; v6e can push TB ~64-96 with the limit raised toward ~100 MB;
# v5e must raise the 16 MB scoped default before growing TB.
MAX_BATCH_TILE = 32
VMEM_LIMIT_BYTES = 48 * 1024 * 1024   # safe on v5e/v6e/v7x; tune per generation

# synthetic "punctuation" token ids (stand-in for the tokenizer skiplist)
SKIPLIST_IDS = jnp.array([3, 5, 7, 11], dtype=jnp.int32)


# --------------------------- parameter init ----------------------------------
def init_params(key):
    ks = jax.random.split(key, 10)
    s = 0.02
    maxlen = max(QUERY_MAXLEN, DOC_MAXLEN)
    return dict(
        tok_emb=s * jax.random.normal(ks[0], (VOCAB, HIDDEN), jnp.float32),
        pos_emb=s * jax.random.normal(ks[1], (maxlen, HIDDEN), jnp.float32),
        wq=s * jax.random.normal(ks[2], (HIDDEN, HIDDEN), jnp.float32),
        wk=s * jax.random.normal(ks[3], (HIDDEN, HIDDEN), jnp.float32),
        wv=s * jax.random.normal(ks[4], (HIDDEN, HIDDEN), jnp.float32),
        wo=s * jax.random.normal(ks[5], (HIDDEN, HIDDEN), jnp.float32),
        w1=s * jax.random.normal(ks[6], (HIDDEN, 4 * HIDDEN), jnp.float32),
        w2=s * jax.random.normal(ks[7], (4 * HIDDEN, HIDDEN), jnp.float32),
        ln0_g=jnp.ones((HIDDEN,), jnp.float32), ln0_b=jnp.zeros((HIDDEN,), jnp.float32),
        ln1_g=jnp.ones((HIDDEN,), jnp.float32), ln1_b=jnp.zeros((HIDDEN,), jnp.float32),
        ln2_g=jnp.ones((HIDDEN,), jnp.float32), ln2_b=jnp.zeros((HIDDEN,), jnp.float32),
        # nn.Linear(hidden, dim, bias=False), stored transposed as [H, DIM]
        w_lin=s * jax.random.normal(ks[8], (HIDDEN, DIM), jnp.float32),
    )


# ---------------- synthetic BERT-like encoder (plain JAX glue) ----------------
def _layer_norm(x, g, b, eps=1e-12):
    mu = x.mean(-1, keepdims=True)
    var = ((x - mu) ** 2).mean(-1, keepdims=True)
    return (x - mu) / jnp.sqrt(var + eps) * g + b


def tiny_bert(p, input_ids, attention_mask):
    L = input_ids.shape[1]
    x = p["tok_emb"][input_ids] + p["pos_emb"][:L][None]
    x = _layer_norm(x, p["ln0_g"], p["ln0_b"])
    q = x @ p["wq"]
    k = x @ p["wk"]
    v = x @ p["wv"]
    s = jnp.einsum("bqh,bkh->bqk", q, k) / jnp.sqrt(jnp.float32(HIDDEN))
    s = s + (1.0 - attention_mask[:, None, :].astype(jnp.float32)) * (-1e9)
    a = jax.nn.softmax(s, axis=-1)
    ctx = jnp.einsum("bqk,bkh->bqh", a, v) @ p["wo"]
    x = _layer_norm(x + ctx, p["ln1_g"], p["ln1_b"])
    h = jax.nn.gelu(x @ p["w1"]) @ p["w2"]
    x = _layer_norm(x + h, p["ln2_g"], p["ln2_b"])
    return x  # [B, L, HIDDEN] == last_hidden_state


# --------------------------- Pallas kernel ------------------------------------
def colbert_score_kernel(qh_ref, dh_ref, w_ref, score_ref):
    # qh_ref: (TB, Lq, H) bf16   dh_ref: (TB, Ld, H) bf16
    # w_ref:  (H, DIM)    bf16   score_ref: (1, 1, TB) f32
    TB, Lq, H = qh_ref.shape
    _, Ld, _ = dh_ref.shape
    Dm = w_ref.shape[1]

    w = w_ref[...]  # bf16, loaded once per step

    # Linear projection (MXU, bf16 in / f32 accumulate); batch flattened into M
    # so the MXU M dimension is TB*L even at small TB.
    Q = jnp.dot(qh_ref[...].reshape(TB * Lq, H), w,
                preferred_element_type=jnp.float32).reshape(TB, Lq, Dm)
    D = jnp.dot(dh_ref[...].reshape(TB * Ld, H), w,
                preferred_element_type=jnp.float32).reshape(TB, Ld, Dm)
    # NOTE: the doc punctuation/pad mask was folded into dh in the wrapper
    # (exact for a binary row mask), matching torch's "mask after projection,
    # before normalize" semantics: masked rows of D are exactly zero here.

    # F.normalize(p=2, dim=-1, eps=1e-12) == x * rsqrt(max(sum(x^2), 1e-24)).
    # The inverse norms are applied to S after the MaxSim matmul (inv_d > 0, so
    # it commutes with the max; inv_q is applied after the max). rsqrt goes to
    # the otherwise-idle EUP slot; all normalization math stays f32.
    inv_q = jax.lax.rsqrt(jnp.maximum(jnp.sum(Q * Q, -1), 1e-24))   # (TB, Lq)
    inv_d = jax.lax.rsqrt(jnp.maximum(jnp.sum(D * D, -1), 1e-24))   # (TB, Ld)

    # MaxSim per batch element: batched (Lq,DIM) x (Ld,DIM)^T, f32 accumulation.
    S = jnp.einsum("bqd,bkd->bqk",
                   Q.astype(jnp.bfloat16), D.astype(jnp.bfloat16),
                   preferred_element_type=jnp.float32)              # (TB, Lq, Ld)

    m = jnp.max(S * inv_d[:, None, :], axis=-1)                     # (TB, Lq)
    score_ref[...] = jnp.sum(m * inv_q, axis=-1).reshape(1, 1, TB)


def _pick_batch_tile(batch):
    # Keep nb = B / tb >= 2 so the "parallel" batch axis actually shards across
    # v7x's two TensorCores, and cap tb so the bf16 double-buffered input blocks
    # stay well under v7x's 64 MiB VMEM at real ColBERT shapes.
    return max(1, min(MAX_BATCH_TILE, batch // 2))


def colbert_maxsim(q_hidden, d_hidden, w_lin, *, tb=None):
    B, Lq, H = q_hidden.shape
    _, Ld, _ = d_hidden.shape
    Dm = w_lin.shape[1]

    if tb is None:
        tb = _pick_batch_tile(B)
    tb = max(1, min(tb, B))

    # bf16 into the kernel: halves HBM traffic on a bandwidth-bound kernel and
    # removes the per-step in-kernel casts. XLA fuses the casts into the
    # encoder's output epilogue. (Binary mask fold already happened upstream.)
    q_hidden = q_hidden.astype(jnp.bfloat16)
    d_hidden = d_hidden.astype(jnp.bfloat16)
    w_lin = w_lin.astype(jnp.bfloat16)

    pad = (-B) % tb
    if pad:
        q_hidden = jnp.pad(q_hidden, ((0, pad), (0, 0), (0, 0)))
        d_hidden = jnp.pad(d_hidden, ((0, pad), (0, 0), (0, 0)))
    nb = (B + pad) // tb

    # Advisory cost model for XLA's scheduler around the custom call.
    flops_per_step = 2 * tb * (Lq + Ld) * H * Dm + 2 * tb * Lq * Ld * Dm
    bytes_per_step = 2 * tb * (Lq + Ld) * H + 2 * H * Dm + 4 * tb
    cost = pl.CostEstimate(
        flops=nb * flops_per_step,
        transcendentals=nb * tb * (Lq + Ld),
        bytes_accessed=nb * bytes_per_step,
    )

    scores = pl.pallas_call(
        colbert_score_kernel,
        out_shape=jax.ShapeDtypeStruct((nb, 1, tb), jnp.float32),
        grid=(nb,),
        in_specs=[
            pl.BlockSpec((tb, Lq, H), lambda b: (b, 0, 0)),
            pl.BlockSpec((tb, Ld, H), lambda b: (b, 0, 0)),
            # TODO(synk): on v7x, pipeline_mode=pl.Buffered(1) here would drop
            # one redundant weight buffer (block index is constant over the grid).
            pl.BlockSpec((H, Dm), lambda b: (0, 0)),
        ],
        # Block's last two dims equal the full array dims (1, tb): one
        # lane-dense store per step, no sublane-partial block ambiguity.
        out_specs=pl.BlockSpec((1, 1, tb), lambda b: (b, 0, 0)),
        compiler_params=pltpu.CompilerParams(
            dimension_semantics=("parallel",),
            vmem_limit_bytes=VMEM_LIMIT_BYTES,
        ),
        cost_estimate=cost,
    )(q_hidden, d_hidden, w_lin)
    return scores.reshape(-1)[:B]


# --------------------------- full forward -------------------------------------
def punctuation_mask(input_ids):
    # mask[b, t] = (token not in skiplist) and (token != 0)
    is_punct = (input_ids[..., None] == SKIPLIST_IDS[None, None, :]).any(-1)
    mask = jnp.logical_and(jnp.logical_not(is_punct), input_ids != PAD_ID)
    return mask.astype(jnp.float32)[..., None]                # (B, Ld, 1)


def colbert_forward(params, q_ids, q_attn, d_ids, d_attn):
    # similarity_metric == 'cosine' (the module default).
    Qh = tiny_bert(params, q_ids, q_attn)                     # (B, Lq, H)
    Dh = tiny_bert(params, d_ids, d_attn)                     # (B, Ld, H)
    # Fold the binary doc mask into the hidden states: ((m*Dh)@W) == m*(Dh@W),
    # so this is exactly the module's "mask after projection, before normalize".
    Dh = Dh * punctuation_mask(d_ids)                         # (B, Ld, H)
    return colbert_maxsim(Qh, Dh, params["w_lin"])            # (B,)


def colbert_forward_ref(params, q_ids, q_attn, d_ids, d_attn):
    # pure-JAX f32 reference for validation (mirrors the PyTorch module exactly)
    Qh = tiny_bert(params, q_ids, q_attn)
    Dh = tiny_bert(params, d_ids, d_attn)
    d_mask = punctuation_mask(d_ids)
    w = params["w_lin"]
    Q = Qh @ w
    Q = Q / jnp.maximum(jnp.linalg.norm(Q, axis=-1, keepdims=True), 1e-12)
    D = (Dh @ w) * d_mask
    D = D / jnp.maximum(jnp.linalg.norm(D, axis=-1, keepdims=True), 1e-12)
    sim = jnp.einsum("bqd,bkd->bqk", Q, D)
    return sim.max(-1).sum(-1)


# ------------------------------- main ------------------------------------------
if __name__ == "__main__":
    key = jax.random.PRNGKey(0)
    k_par, k_q, k_d = jax.random.split(key, 3)

    B = 4
    params = init_params(k_par)

    # deterministic synthetic token ids (with some padding and "punctuation")
    q_ids = jax.random.randint(k_q, (B, QUERY_MAXLEN), 1, VOCAB, dtype=jnp.int32)
    d_ids = jax.random.randint(k_d, (B, DOC_MAXLEN), 1, VOCAB, dtype=jnp.int32)
    d_ids = d_ids.at[:, -3:].set(PAD_ID)          # pad tail of docs
    d_ids = d_ids.at[0, 2].set(3)                 # a punctuation token
    d_ids = d_ids.at[1, 5].set(7)                 # a punctuation token
    q_attn = (q_ids != PAD_ID).astype(jnp.int32)
    d_attn = (d_ids != PAD_ID).astype(jnp.int32)

    scores = jax.jit(colbert_forward)(params, q_ids, q_attn, d_ids, d_attn)
    jax.block_until_ready(scores)

    ref = colbert_forward_ref(params, q_ids, q_attn, d_ids, d_attn)
    assert scores.shape == (B,)
    # bf16 MXU inputs => looser tolerance than a pure-f32 kernel.
    assert jnp.allclose(scores, ref, rtol=2e-2, atol=2e-2), (scores, ref)

    print("KERNEL_OK")
</pallas_src>

<mosaic_0001>
module attributes {stable_mosaic.version = 11 : i64} {
  func.func @colbert_score_kernel(%arg0: i32, %arg1: memref<2x8x32xbf16, #tpu.memory_space<vmem>>, %arg2: memref<2x16x32xbf16, #tpu.memory_space<vmem>>, %arg3: memref<32x128xbf16, #tpu.memory_space<vmem>>, %arg4: memref<1x1x2xf32, #tpu.memory_space<vmem>>) attributes {dimension_semantics = [#tpu.dimension_semantics<parallel>], iteration_bounds = array<i64: 2>, scalar_prefetch = 0 : i64, scratch_operands = 0 : i64, tpu.core_type = #tpu.core_type<tc>, window_params = [{transform_indices = @transform_0, window_bounds = array<i64: 2, 8, 32>}, {transform_indices = @transform_1, window_bounds = array<i64: 2, 16, 32>}, {pipeline_mode = #tpu.pipeline_mode<synchronous>, transform_indices = @transform_2, window_bounds = array<i64: 32, 128>}, {transform_indices = @transform_3, window_bounds = array<i64: 1, 1, 2>}]} {
    %c0 = arith.constant 0 : index
    %c0_0 = arith.constant 0 : index
    %0 = vector.load %arg3[%c0, %c0_0] : memref<32x128xbf16, #tpu.memory_space<vmem>>, vector<32x128xbf16>
    %c0_1 = arith.constant 0 : index
    %c0_2 = arith.constant 0 : index
    %c0_3 = arith.constant 0 : index
    %1 = vector.load %arg1[%c0_1, %c0_2, %c0_3] : memref<2x8x32xbf16, #tpu.memory_space<vmem>>, vector<2x8x32xbf16>
    %2 = vector.shape_cast %1 : vector<2x8x32xbf16> to vector<16x32xbf16>
    %cst = arith.constant dense<0.000000e+00> : vector<16x128xf32>
    %3 = tpu.matmul %2, %0, %cst {dimension_numbers = #tpu.dot_dimension_numbers<[1], [0], [0], [1], [0, 0, 1, 1], [], []>} : vector<16x32xbf16>, vector<32x128xbf16>, vector<16x128xf32> -> vector<16x128xf32>
    %4 = vector.shape_cast %3 : vector<16x128xf32> to vector<2x8x128xf32>
    %c0_4 = arith.constant 0 : index
    %c0_5 = arith.constant 0 : index
    %c0_6 = arith.constant 0 : index
    %5 = vector.load %arg2[%c0_4, %c0_5, %c0_6] : memref<2x16x32xbf16, #tpu.memory_space<vmem>>, vector<2x16x32xbf16>
    %6 = vector.shape_cast %5 : vector<2x16x32xbf16> to vector<32x32xbf16>
    %cst_7 = arith.constant dense<0.000000e+00> : vector<32x128xf32>
    %7 = tpu.matmul %6, %0, %cst_7 {dimension_numbers = #tpu.dot_dimension_numbers<[1], [0], [0], [1], [0, 0, 1, 1], [], []>} : vector<32x32xbf16>, vector<32x128xbf16>, vector<32x128xf32> -> vector<32x128xf32>
    %8 = vector.shape_cast %7 : vector<32x128xf32> to vector<2x16x128xf32>
    %9 = arith.mulf %4, %4 : vector<2x8x128xf32>
    %cst_8 = arith.constant dense<0.000000e+00> : vector<2x8xf32>
    %10 = vector.multi_reduction <add>, %9, %cst_8 [2] : vector<2x8x128xf32> to vector<2x8xf32>
    %cst_9 = arith.constant 1.000000e-24 : f32
    %11 = vector.broadcast %cst_9 : f32 to vector<2x8xf32>
    %12 = arith.maximumf %10, %11 : vector<2x8xf32>
    %13 = math.rsqrt %12 : vector<2x8xf32>
    %14 = arith.mulf %8, %8 : vector<2x16x128xf32>
    %cst_10 = arith.constant dense<0.000000e+00> : vector<2x16xf32>
    %15 = vector.multi_reduction <add>, %14, %cst_10 [2] : vector<2x16x128xf32> to vector<2x16xf32>
    %cst_11 = arith.constant 1.000000e-24 : f32
    %16 = vector.broadcast %cst_11 : f32 to vector<2x16xf32>
    %17 = arith.maximumf %15, %16 : vector<2x16xf32>
    %18 = math.rsqrt %17 : vector<2x16xf32>
    %19 = arith.truncf %4 : vector<2x8x128xf32> to vector<2x8x128xbf16>
    %20 = arith.truncf %8 : vector<2x16x128xf32> to vector<2x16x128xbf16>
    "tpu.trace_start"() <{level = 10 : i32, message = "bqd,bkd->bqk"}> : () -> ()
    %cst_12 = arith.constant dense<0.000000e+00> : vector<2x8x16xf32>
    %21 = tpu.matmul %19, %20, %cst_12 {dimension_numbers = #tpu.dot_dimension_numbers<[2], [2], [1], [1], [0, 0, 0, 1, 1, 1], [0], [0]>} : vector<2x8x128xbf16>, vector<2x16x128xbf16>, vector<2x8x16xf32> -> vector<2x8x16xf32>
    "tpu.trace_stop"() : () -> ()
    %22 = vector.shape_cast %18 : vector<2x16xf32> to vector<2x1x16xf32>
    %23 = vector.broadcast %22 : vector<2x1x16xf32> to vector<2x8x16xf32>
    %24 = arith.mulf %21, %23 : vector<2x8x16xf32>
    %cst_13 = arith.constant dense<0xFF800000> : vector<2x8xf32>
    %25 = vector.multi_reduction <maximumf>, %24, %cst_13 [2] : vector<2x8x16xf32> to vector<2x8xf32>
    %26 = arith.mulf %25, %13 : vector<2x8xf32>
    %cst_14 = arith.constant dense<0.000000e+00> : vector<2xf32>
    %27 = vector.multi_reduction <add>, %26, %cst_14 [1] : vector<2x8xf32> to vector<2xf32>
    %28 = vector.shape_cast %27 : vector<2xf32> to vector<1x1x2xf32>
    %c0_15 = arith.constant 0 : index
    %c0_16 = arith.constant 0 : index
    %c0_17 = arith.constant 0 : index
    %29 = vector.load %arg4[%c0_15, %c0_16, %c0_17] : memref<1x1x2xf32, #tpu.memory_space<vmem>>, vector<1x1x2xf32>
    tpu.vector_store %arg4[%c0_15, %c0_16, %c0_17], %28 {strides = array<i32>} : memref<1x1x2xf32, #tpu.memory_space<vmem>>, vector<1x1x2xf32>,
    return
  }
  func.func @transform_0(%arg0: i32) -> (i32, i32, i32) {
    %c0_i32 = arith.constant 0 : i32
    %c0_i32_0 = arith.constant 0 : i32
    %c0_i32_1 = arith.constant 0 : i32
    return %arg0, %c0_i32, %c0_i32_0 : i32, i32, i32
  }
  func.func @transform_1(%arg0: i32) -> (i32, i32, i32) {
    %c0_i32 = arith.constant 0 : i32
    %c0_i32_0 = arith.constant 0 : i32
    %c0_i32_1 = arith.constant 0 : i32
    return %arg0, %c0_i32, %c0_i32_0 : i32, i32, i32
  }
  func.func @transform_2(%arg0: i32) -> (i32, i32) {
    %c0_i32 = arith.constant 0 : i32
    %c0_i32_0 = arith.constant 0 : i32
    %c0_i32_1 = arith.constant 0 : i32
    return %c0_i32, %c0_i32_0 : i32, i32
  }
  func.func @transform_3(%arg0: i32) -> (i32, i32, i32) {
    %c0_i32 = arith.constant 0 : i32
    %c0_i32_0 = arith.constant 0 : i32
    %c0_i32_1 = arith.constant 0 : i32
    return %arg0, %c0_i32, %c0_i32_0 : i32, i32, i32
  }
}

</mosaic_0001>

<bundles_post_ra>
// kernel: colbert_forward.1
= control target key start
LH: loop header
LB: loop body
LE: loop exit
PB: predicated region body
PF: predicated region fallthrough
CT: control target
= control target key end

     0   :  { %s704_s12 = smov 0   ;;  %s738_s0 = inlined_call_operand.vmem [shape: bf16[4,8,32], index: 0, kind: input, shape index: {}]   ;;  %s739_s1 = inlined_call_operand.vmem [shape: bf16[4,16,32], index: 1, kind: input, shape index: {}]   ;;  %s740_s2 = inlined_call_operand.vmem [shape: bf16[32,128], index: 2, kind: input, shape index: {}]   ;;  %s741_s3 = inlined_call_operand.vmem [shape: f32[2,1,2], index: 3, kind: output, shape index: {}]  }
   0x1 LB: > { %s710_s13 = sadd.s32 4294967295, %s680_s12   ;;  %p591_p0 = scmp.ge.s32.totalorder %s680_s12, 1  ;;  %s680_s12 = sphi %s704_s12, %s13_s12  }
   0x2   : > { %p150_p1 = scmp.lt.s32.totalorder %s680_s12, 3 }
   0x4   : > { %p151_p2 = pnand %p591_p0, %p150_p1 }
   0x5   : > { %v657_v0 = vld [vmem:[%s740_s2] sm:$0xff] (!%p151_p2)   ;;  %v658_v1 = vld [vmem:[%s740_s2 + $0x8] sm:$0xff] (!%p151_p2)   ;;  %v682_v2 = vmov (!%p151_p2), 0.0   ;;  %s592_s18 = sshll.u32 (!%p151_p2), %s710_s13, 1  ;;  %vm683_vm0 = vmmov (!%p151_p2), 0   ;;  %vm218_vm1 = vcmask (!%p151_p2), 261120   ;;  %v450_v32 = vlaneseq (!%p151_p2) }
   0x6   : > { %154 = sbr.rel (%p151_p2) target bundleno = 750 (0x2ee), region = 32  ;;  %619 = vmatprep.subr.bf16.mxu0 (!%p151_p2), %v682_v2  ;;  %627 = vmatprep.subr.bf16.mxu1 (!%p151_p2), %v657_v0  ;;  %p179_p3 = scmp.lt.s32.totalorder (!%p151_p2), %s592_s18, 3  ;;  %vm461_vm2 = vcmask (!%p151_p2), 130112   ;;  %vm495_vm3 = vcmask (!%p151_p2), 130048   ;;  %vm472_vm4 = vcmask (!%p151_p2), 1041409   ;;  %vm516_vm5 = vcmask (!%p151_p2), 58368  }
   0x7   : > { %620 = vmatpush3.bf16.msra.mxu0 (!%p151_p2), %v657_v0  ;;  %628 = vmatpush3.bf16.msra.mxu1 (!%p151_p2), %v657_v0  ;;  %v451_v33 = vand.u32 (!%p151_p2), 127, %v450_v32  ;;  %v453_v35 = vshrl.u32 (!%p151_p2), %v450_v32, 7  ;;  %p191_p4 = scmp.lt.s32.totalorder (!%p151_p2), %s710_s13, 1  ;;  %vm526_vm6 = vcmask (!%p151_p2), 8192  }
   0x8   : > { %621 = vmatprep.subr.bf16.mxu0 (!%p151_p2), %v682_v2  ;;  %629 = vmatprep.subr.bf16.mxu1 (!%p151_p2), %v658_v1 }
   0x9   : > { %623 = vmatprep.mubr.msk.bf16.mxu0 (!%p151_p2), %vm683_vm0, %v682_v2  ;;  %v456_v34 = vadd.s32 (!%p151_p2), 4294967288, %v451_v33  ;;  %v454_v39 = vsub.s32 (!%p151_p2), %v451_v33, %v453_v35 }
   0xb   : > { %622 = vmatpush3.bf16.msra.mxu0 (!%p151_p2), %v658_v1  ;;  %630 = vmatpush3.bf16.msra.mxu1 (!%p151_p2), %v658_v1  ;;  %v459_v36 = vsub.s32 (!%p151_p2), %v456_v34, %v453_v35 }
   0xc   : > { %635 = vmatprep.subr.bf16.mxu0 (!%p151_p2), %v682_v2  ;;  %641 = vmatprep.subr.bf16.mxu1 (!%p151_p2), %v682_v2 }
   0xd   : > { %s743_s18 = smov (!%p179_p3, %s592_s18), 3  ;;  %s745_s13 = smov (!%p191_p4, %s710_s13), 1 }
   0xe   : > { %s607_s19 = sshll.u32 %s743_s18, 3  ;;  %s593_s20 = sshll.u32 %s743_s18, 2 }
   0xf   : > { %s189_s23 = scalar_lea.vmem %s739_s1, %s607_s19  ;;  %s182_s26 = scalar_lea.vmem %s738_s0, %s593_s20 }
  0x10   : > { %v659_v3 = vld [vmem:[%s189_s23] sm:$0xff]   ;;  %v660_v4 = vld [vmem:[%s189_s23 + $0x8] sm:$0xff]   ;;  %s193_s29 = scalar_lea.vmem %s741_s3, %s745_s13 }
  0x11   : > { %631 = vmatprep.mubr.msk.bf16.mxu1 %vm218_vm1, %v659_v3  ;;  %v661_v5 = vld [vmem:[%s182_s26] sm:$0xff]  }
  0x12   : > { %632 = vmatmul.mubr.msk.bf16.vlgmr.msra.gmra.mrb[0].mxu1 %vm218_vm1, %v660_v4  ;;  %624 = vmatmul.mubr.msk.bf16.vlgmr.msra.gmra.mrb[0].mxu0 %vm218_vm1, %v661_v5 }
  0x13   : > { %643 = vmatprep.mubr.msk.bf16.mxu1 %vm683_vm0, %v682_v2  ;;  %637 = vmatprep.mubr.msk.bf16.mxu0 %vm683_vm0, %v682_v2 }
  0xe5   : > { %v633_v6 = vpop.f32.mrb[0].mxu1  ;;  %v256_v9 = vpop.f32.mrb[0].mxu0 }
  0xe6   : > { %v317_v7 = vpop.f32.mrb[1].mxu1  ;;  %v344_v8 = vmul.f32 %v633_v6, %v633_v6  ;;  %v625_v12 = vpop.f32.mrb[1].mxu0  ;;  %v332_v22 = vmul.f32 %v256_v9, %v256_v9  ;;  %v362_v23 = vpack.c.bf16 %v256_v9, %v256_v9 }
  0xe7   : > { %v634_v10 = vpop.f32.mrb[2].mxu1  ;;  %v342_v11 = vmul.f32 %v317_v7, %v317_v7  ;;  %v259_v15 = vpop.f32.mrb[2].mxu0 }
  0xe8   : > { %v365_v13 = vpack.c.bf16 %v634_v10, %v633_v6  ;;  %350 = vadd.xlane.f32.xlu1 %v344_v8  ;;  %v320_v14 = vpop.f32.mrb[3].mxu1  ;;  %v626_v17 = vpop.f32.mrb[3].mxu0  ;;  %v345_v18 = vmul.f32 %v634_v10, %v634_v10  ;;  %v333_v20 = vmul.f32 %v259_v15, %v259_v15  ;;  %v363_v21 = vpack.c.bf16 %v259_v15, %v259_v15 }
  0xe9   : > { %v364_v16 = vpack.c.bf16 %v320_v14, %v317_v7  ;;  %346 = vadd.xlane.f32.xlu0 %v342_v11  ;;  %v343_v19 = vmul.f32 %v320_v14, %v320_v14 }
  0xea   : > { %642 = vmatpush3.bf16.xpose.msra.mxu1 %v365_v13 }
  0xeb   : > { %636 = vmatpush3.bf16.xpose.msra.mxu0 %v364_v16 }
  0xec   : > { %352 = vadd.xlane.f32.xlu1 %v345_v18 }
  0xed   : > { %348 = vadd.xlane.f32.xlu0 %v343_v19 }
  0xf0   : > { %336 = vadd.xlane.f32.xlu1 %v333_v20 }
  0xf1   : > { %334 = vadd.xlane.f32.xlu0 %v332_v22  ;;  %644 = vmatmul.mubr.bf16.vlgmr.msra.gmra.mrb[4].mxu1 %v363_v21 }
  0xf2   : > { %638 = vmatmul.mubr.bf16.vlgmr.msra.gmra.mrb[4].mxu0 %v362_v23 }
 0x175   : > { %v351_v24 = vpop.xlane.xlu1 %350 }
 0x176   : > { %v347_v25 = vpop.xlane.xlu0 %346  ;;  %v356_v30 = vmax.f32 %v351_v24, 1e-24 }
 0x177   : > { %v354_v31 = vmax.f32 %v347_v25, 1e-24 }
 0x179   : > { %v353_v26 = vpop.xlane.xlu1 %352 }
 0x17a   : > { %v349_v27 = vpop.xlane.xlu0 %348  ;;  %v357_v28 = vmax.f32 %v353_v26, 1e-24 }
 0x17b   : > { %v355_v29 = vmax.f32 %v349_v27, 1e-24 }
 0x17c   : > { %662 = vrsqrt.f32 %v357_v28 }
 0x17d   : > { %664 = vrsqrt.f32 %v355_v29  ;;  %v337_v60 = vpop.xlane.xlu1 %336 }
 0x17e   : > { %666 = vrsqrt.f32 %v356_v30  ;;  %v335_v61 = vpop.xlane.xlu0 %334  ;;  %v339_v62 = vmax.f32 %v337_v60, 1e-24 }
 0x17f   : > { %668 = vrsqrt.f32 %v354_v31  ;;  %v338_v63 = vmax.f32 %v335_v61, 1e-24 }
 0x180   : > { %670 = vrsqrt.f32 %v339_v62 }
 0x181   : > { %672 = vrsqrt.f32 %v338_v63 }
 0x186   : > { %v663_v37 = vpop.eup %662 }
 0x187   : > { %v665_v38 = vpop.eup %664  ;;  %v470_v42 = vrot.slane %v663_v37, %v459_v36 }
 0x188   : > { %v667_v40 = vpop.eup %666  ;;  %v460_v43 = vrot.slane %v665_v38, %v459_v36 }
 0x189   : > { %v669_v41 = vpop.eup %668  ;;  %v466_v44 = vrot.slane %v667_v40, %v454_v39 }
 0x18a   : > { %v455_v45 = vrot.slane %v669_v41, %v454_v39  ;;  %v671_v0 = vpop.eup %670 }
 0x18b   : > { %v471_v47 = vsel %vm461_vm2, %v470_v42, %v466_v44  ;;  %v673_v2 = vpop.eup %672 }
 0x18c   : > { %v462_v50 = vsel %vm461_vm2, %v460_v43, %v455_v45 }
 0x1c4   : > { %v440_v46 = vpop.f32.mrb[4].mxu1 }
 0x1c5   : > { %v494_v48 = vmul.f32 %v471_v47, %v440_v46  ;;  %v400_v49 = vpop.f32.mrb[4].mxu0  ;;  %v645_v51 = vpop.f32.mrb[5].mxu1 }
 0x1c6   : > { %v493_v52 = vmul.f32 %v462_v50, %v400_v49  ;;  %v639_v53 = vpop.f32.mrb[5].mxu0  ;;  %v443_v54 = vpop.f32.mrb[6].mxu1 }
 0x1c7   : > { %v403_v55 = vpop.f32.mrb[6].mxu0  ;;  %v646_v56 = vpop.f32.mrb[7].mxu1  ;;  %v499_v57 = vsel %vm495_vm3, %v494_v48, -inf }
 0x1c8   : > { %500 = vmax.xlane.f32.xlu1 %v499_v57  ;;  %v640_v58 = vpop.f32.mrb[7].mxu0  ;;  %v496_v59 = vsel %vm495_vm3, %v493_v52, -inf }
 0x1c9   : > { %497 = vmax.xlane.f32.xlu0 %v496_v59 }
 0x255   : > { %v501_v1 = vpop.xlane.xlu1 %500 }
 0x256   : > { %v503_v3 = vmul.f32 %v671_v0, %v501_v1  ;;  %v498_v4 = vpop.xlane.xlu0 %497 }
 0x257   : > { %v502_v5 = vmul.f32 %v673_v2, %v498_v4 }
 0x258   : > { %v513_v6 = vrot.slane %v503_v3, %v454_v39 }
 0x259   : > { %v509_v7 = vrot.slane %v502_v5, %v454_v39 }
 0x25b   : > { %v514_v8 = vsel %vm472_vm4, %v513_v6, %v509_v7 }
 0x25c   : > { %v517_v9 = vsel %vm516_vm5, %v514_v8, 0.0 }
 0x25d   : > { %518 = vadd.xlane.f32.xlu0 %v517_v9 }
 0x2ea   : > { %v519_v10 = vpop.xlane.xlu0 %518 }
 0x2eb   : > { %v524_v11 = vrot.slane %v519_v10, %v454_v39 }
 0x2ed   : > { %527 = vst.msk [vmem:[%s193_s29] sm:$0x1] %vm526_vm6, %v524_v11 }
 0x2ee PF: > { %s13_s12 = sadd.s32 1, %s680_s12  }
 0x2ef   : > { %p10_p5 = scmp.ge.s32.totalorder %s13_s12, 4  }
 0x2f1   :  { %12 = sbr.rel (!%p10_p5) target bundleno = 1 (0x1), region = 65 }

</bundles_post_ra>
